<compile_context>
chip_gen: v6e
topology: v6e:2x2x1
jax: 0.10.0
libtpu: 0.0.40
codegen_flags: <defaults>
</compile_context>

<pallas_src>
import functools

import jax
import jax.numpy as jnp
from jax import lax
from jax.experimental import pallas as pl
from jax.experimental.pallas import tpu as pltpu


def _round_up(x, m):
    return (x + m - 1) // m * m


def _itemsize(dt):
    return 2 if dt == jnp.bfloat16 else 4


# ---------------------------------------------------------------------------
# Projection kernel:  (M, D) @ (D, Hs) -> (M, Hs), M tiled over the grid.
# ---------------------------------------------------------------------------
def _proj_kernel(x_ref, w_ref, o_ref):
    o_ref[...] = jnp.dot(x_ref[...], w_ref[...],
                         preferred_element_type=jnp.float32).astype(o_ref.dtype)


def _project(x2d, w, out_dtype):
    M, D = x2d.shape
    Hs = w.shape[1]
    tm = 256 if M >= 256 else _round_up(max(M, 1), 8)
    Mp = _round_up(M, tm)
    if Mp != M:
        x2d = jnp.pad(x2d, ((0, Mp - M), (0, 0)))
    out = pl.pallas_call(
        _proj_kernel,
        out_shape=jax.ShapeDtypeStruct((Mp, Hs), out_dtype),
        grid_spec=pltpu.PrefetchScalarGridSpec(
            num_scalar_prefetch=0,
            grid=(Mp // tm,),
            in_specs=[
                pl.BlockSpec((tm, D), lambda i: (i, 0)),
                pl.BlockSpec((D, Hs), lambda i: (0, 0)),
            ],
            out_specs=pl.BlockSpec((tm, Hs), lambda i: (i, 0)),
        ),
        compiler_params=pltpu.CompilerParams(
            dimension_semantics=("parallel",)),
    )(x2d, w)
    return out[:M]
    # TODO(synk): fusing the Q and K projections into one pallas_call needs a
    # block-diagonal weight (Dq != Dk); skipped — projections are a tiny
    # fraction of total work.


# ---------------------------------------------------------------------------
# Attention kernel: grid = (batch blocks, key chunks), online softmax over k.
# Hidden dim lives on the sublane axis; key chunk TK is the lane axis.
# ---------------------------------------------------------------------------
def _attn_kernel(blkeff_ref,               # (nB,) int32 scalar-prefetch (SMEM)
                 qp_ref,                   # (Bt, Lq, Hs, 1)  f32
                 kpt_ref,                  # (Bt, Hs, TK)     storage dtype
                 v_ref,                    # (Bt, TK, Dvp)    storage dtype
                 wv_ref,                   # (Hs, 1)          f32
                 vl_ref,                   # (Bt, Lq, 1)      int32
                 o_ref,                    # (Bt, Lq, Dvp)    f32, resident acc
                 m_sc, l_sc,               # (Bt, Lq, 1)      f32 VMEM scratch
                 *, lk_real, mask_pad, feature_dtype):
    kblk = pl.program_id(1)
    nk = pl.num_programs(1)
    tk = kpt_ref.shape[2]

    @pl.when(kblk == 0)
    def _init():
        m_sc[...] = jnp.full_like(m_sc, -jnp.inf)
        l_sc[...] = jnp.zeros_like(l_sc)
        o_ref[...] = jnp.zeros_like(o_ref)

    # Key chunks at/after this batch block's needed key length are skipped
    # (their DMA is also suppressed via the clamped index_map).
    run = kblk * tk < blkeff_ref[pl.program_id(0)]

    @pl.when(run)
    def _compute():
        qp = qp_ref[...].astype(feature_dtype)     # (Bt, Lq, Hs, 1)
        kpt = kpt_ref[...].astype(feature_dtype)   # (Bt, Hs, TK)
        wv = wv_ref[...].astype(feature_dtype)     # (Hs, 1)

        # features = tanh(q_proj[..., None] + k_projT[:, None]) : (Bt,Lq,Hs,TK)
        feats = jnp.tanh(qp + kpt[:, None, :, :])
        # scores[b,q,k] = sum_h w_v[h] * feats[b,q,h,k]   (f32 accumulation,
        # multiply stays in feature_dtype; sublane reduce over Hs).
        scores = jnp.sum(feats * wv, axis=2, dtype=jnp.float32)   # (Bt,Lq,TK)

        key_pos = kblk * tk + lax.broadcasted_iota(jnp.int32, scores.shape, 2)
        # masked_softmax semantics: genuinely masked (real) keys -> -1e6.
        scores = jnp.where(key_pos < vl_ref[...], scores, jnp.float32(-1e6))
        if mask_pad:
            # padded key slots beyond the true Lk -> -inf (exp == 0 exactly),
            # so valid_len == 0 rows stay uniform over Lk like the reference.
            scores = jnp.where(key_pos < lk_real, scores, -jnp.inf)

        m_prev = m_sc[...]
        m_new = jnp.maximum(m_prev, jnp.max(scores, axis=-1, keepdims=True))
        alpha = jnp.exp(m_prev - m_new)
        p = jnp.exp(scores - m_new)                                # (Bt,Lq,TK)
        l_sc[...] = alpha * l_sc[...] + jnp.sum(p, axis=-1, keepdims=True)
        pv = jnp.einsum("bqk,bkd->bqd", p.astype(v_ref.dtype), v_ref[...],
                        preferred_element_type=jnp.float32)
        o_ref[...] = alpha * o_ref[...] + pv
        m_sc[...] = m_new

    # TODO(synk): dropout on the attention weights is eval-mode identity here.

    @pl.when(kblk == nk - 1)
    def _finalize():
        o_ref[...] = o_ref[...] * pl.reciprocal(l_sc[...], approx=True)


# ---------------------------------------------------------------------------
# Wrapper
# ---------------------------------------------------------------------------
def additive_attention(queries, keys, values, valid_lens, W_q, W_k, w_v,
                       *, block_b=None, block_k=None,
                       feature_dtype=jnp.bfloat16,
                       storage_dtype=jnp.bfloat16):
    """Pallas forward of AdditiveAttention (eval mode).

    queries (B,Lq,Dq)  keys (B,Lk,Dk)  values (B,Lk,Dv)
    valid_lens: None, (B,) or (B,Lq) int
    W_q (Dq,H)  W_k (Dk,H)  w_v (H,1)   (nn.Linear weights pre-transposed)
    feature_dtype / storage_dtype: bf16 defaults are best on v6e/v7x (bf16
    VPU/EUP, halved HBM streaming); pass jnp.float32 on v5e or for exactness.
    """
    B, Lq, Dq = queries.shape
    _, Lk, Dk = keys.shape
    _, _, Dv = values.shape
    H = W_q.shape[1]

    H_s = _round_up(H, 8)        # hidden on the sublane axis (not 128 lanes)
    Dvp = _round_up(Dv, 128)     # value features stay lane-dense
    fbytes = _itemsize(feature_dtype)
    sbytes = _itemsize(storage_dtype)

    # -- key-chunk size: lane-dense multiples of 128 (shrink block_b instead) --
    if block_k is None:
        block_k = min(512, _round_up(Lk, 128))
    else:
        block_k = _round_up(int(block_k), 128)
    Lkp = _round_up(Lk, block_k)

    # -- batch-block size from a conservative (v7x 64 MiB-safe) VMEM budget ----
    per_b = (Lq * H_s * block_k * fbytes            # add/tanh intermediate
             + 2 * (H_s + Dvp) * block_k * sbytes   # double-buffered kpT/vals
             + Lq * Dvp * 4                         # resident f32 output block
             + Lq * H_s * 128 * 4)                  # (Lq,Hs,1) q tile, lane-padded
    if block_b is None:
        block_b = max(1, min(B, (6 << 20) // max(per_b, 1)))
        if B >= 2:   # keep >=2 batch blocks so v7x's 2 TensorCores both get work
            block_b = min(block_b, -(-B // 2))
    block_b = max(1, min(int(block_b), B))
    Bp = _round_up(B, block_b)
    nB, nK = Bp // block_b, Lkp // block_k
    # TODO(synk): very long query sequences would additionally need Lq tiling.

    # -- hoisted projections (f32 MXU); K projection stored transposed ---------
    Wq_p = jnp.pad(W_q.astype(jnp.float32), ((0, 0), (0, H_s - H)))
    Wk_p = jnp.pad(W_k.astype(jnp.float32), ((0, 0), (0, H_s - H)))
    wv_p = jnp.pad(w_v.astype(jnp.float32).reshape(H, 1), ((0, H_s - H), (0, 0)))

    qp = _project(queries.astype(jnp.float32).reshape(B * Lq, Dq), Wq_p,
                  jnp.float32).reshape(B, Lq, H_s)
    qp4 = jnp.pad(qp, ((0, Bp - B), (0, 0), (0, 0)))[..., None]    # (Bp,Lq,Hs,1)

    kp = _project(keys.astype(jnp.float32).reshape(B * Lk, Dk), Wk_p,
                  storage_dtype).reshape(B, Lk, H_s)
    kpT = jnp.pad(kp.transpose(0, 2, 1),                            # (B,Hs,Lk)
                  ((0, Bp - B), (0, 0), (0, Lkp - Lk)))

    vals = jnp.pad(values.astype(storage_dtype),
                   ((0, Bp - B), (0, Lkp - Lk), (0, Dvp - Dv)))

    # -- valid_lens: None, (B,) or (B,Lq); padded batch rows get 1 -------------
    if valid_lens is None:
        valid = jnp.full((B, Lq), Lk, dtype=jnp.int32)
    else:
        valid = jnp.asarray(valid_lens, dtype=jnp.int32)
        valid = (jnp.broadcast_to(valid[:, None], (B, Lq))
                 if valid.ndim == 1 else valid.reshape(B, Lq))
    valid = jnp.pad(valid, ((0, Bp - B), (0, 0)), constant_values=1)
    vl3d = valid[:, :, None]                                        # (Bp,Lq,1)

    # Keys that each batch block actually needs.  Rows with valid_len == 0 need
    # every real key (uniform softmax over Lk, like the reference).
    vmax = valid.reshape(nB, block_b * Lq).max(axis=1)
    vmin = valid.reshape(nB, block_b * Lq).min(axis=1)
    blk_eff = jnp.maximum(jnp.where(vmin <= 0, Lk, vmax), 1).astype(jnp.int32)

    def _kv_map(b, k, blkeff_ref):
        # Clamp the key-chunk index for skipped chunks: repeating the previous
        # block index suppresses the HBM copy for keys/values we never touch.
        last = (blkeff_ref[b] - 1) // block_k
        return (b, jnp.minimum(k, last), 0)

    grid_spec = pltpu.PrefetchScalarGridSpec(
        num_scalar_prefetch=1,
        grid=(nB, nK),
        in_specs=[
            pl.BlockSpec((block_b, Lq, H_s, 1), lambda b, k, be: (b, 0, 0, 0)),
            pl.BlockSpec((block_b, H_s, block_k), _kv_map),
            pl.BlockSpec((block_b, block_k, Dvp), _kv_map),
            pl.BlockSpec((H_s, 1), lambda b, k, be: (0, 0)),
            pl.BlockSpec((block_b, Lq, 1), lambda b, k, be: (b, 0, 0)),
        ],
        out_specs=pl.BlockSpec((block_b, Lq, Dvp), lambda b, k, be: (b, 0, 0)),
        scratch_shapes=[
            pltpu.VMEM((block_b, Lq, 1), jnp.float32),   # running max
            pltpu.VMEM((block_b, Lq, 1), jnp.float32),   # running denominator
        ],
    )

    vmem_limit = int(min(56 << 20, max(24 << 20, 4 * block_b * per_b)))

    out = pl.pallas_call(
        functools.partial(_attn_kernel, lk_real=Lk, mask_pad=(Lkp != Lk),
                          feature_dtype=feature_dtype),
        out_shape=jax.ShapeDtypeStruct((Bp, Lq, Dvp), jnp.float32),
        grid_spec=grid_spec,
        compiler_params=pltpu.CompilerParams(
            dimension_semantics=("parallel", "arbitrary"),
            vmem_limit_bytes=vmem_limit),
    )(blk_eff, qp4, kpT, vals, wv_p, vl3d)

    return out[:B, :, :Dv].astype(values.dtype)


# ---------------------------------------------------------------------------
# Pure-JAX reference + self-test
# ---------------------------------------------------------------------------
def _reference(queries, keys, values, valid_lens, W_q, W_k, w_v):
    qp = queries @ W_q
    kp = keys @ W_k
    feats = jnp.tanh(qp[:, :, None, :] + kp[:, None, :, :])
    scores = jnp.squeeze(feats @ w_v, -1)                      # (B, Lq, Lk)
    if valid_lens is not None:
        Lk = scores.shape[-1]
        vl = (valid_lens[:, None, None] if valid_lens.ndim == 1
              else valid_lens[:, :, None])
        mask = jnp.arange(Lk)[None, None, :] < vl
        scores = jnp.where(mask, scores, -1e6)
    attn = jax.nn.softmax(scores, axis=-1)
    return attn @ values


def _check(name, queries, keys, values, valid_lens, W_q, W_k, w_v, *, tol, **kw):
    out = additive_attention(queries, keys, values, valid_lens,
                             W_q, W_k, w_v, **kw)
    out = jax.block_until_ready(out)
    ref = _reference(queries, keys, values, valid_lens, W_q, W_k, w_v)
    assert out.shape == ref.shape, (name, out.shape, ref.shape)
    err = jnp.max(jnp.abs(out - ref))
    assert jnp.allclose(out, ref, atol=tol, rtol=tol), \
        f"{name}: max abs err {err}"
    return out


if __name__ == "__main__":
    key = jax.random.PRNGKey(0)
    ks = jax.random.split(key, 8)

    # Config 1: the module's toy shapes (exact f32 path, tight tolerance).
    B, Lq, Lk = 2, 4, 8
    Dq, Dk, H, Dv = 20, 16, 32, 24
    queries = jax.random.normal(ks[0], (B, Lq, Dq), jnp.float32)
    keys = jax.random.normal(ks[1], (B, Lk, Dk), jnp.float32)
    values = jax.random.normal(ks[2], (B, Lk, Dv), jnp.float32)
    W_q = jax.random.normal(ks[3], (Dq, H), jnp.float32) * 0.1
    W_k = jax.random.normal(ks[4], (Dk, H), jnp.float32) * 0.1
    w_v = jax.random.normal(ks[5], (H, 1), jnp.float32) * 0.1

    f32 = dict(feature_dtype=jnp.float32, storage_dtype=jnp.float32)
    _check("batch_valid_lens", queries, keys, values,
           jnp.array([3, 6], jnp.int32), W_q, W_k, w_v, tol=2e-3, **f32)
    _check("per_query_valid_lens", queries, keys, values,
           jnp.array([[1, 2, 3, 4], [2, 4, 6, 8]], jnp.int32),
           W_q, W_k, w_v, tol=2e-3, **f32)
    _check("no_valid_lens", queries, keys, values, None,
           W_q, W_k, w_v, tol=2e-3, **f32)

    # Config 2: tiled/padded key axis, online softmax across chunks, skipped
    # chunks (compute + DMA), odd batch with padding, and a fully-masked row
    # (valid_len == 0), on the default bf16 storage/compute path.
    B2, Lk2 = 3, 300
    q2 = jax.random.normal(ks[6], (B2, Lq, Dq), jnp.float32)
    k2 = jax.random.normal(ks[7], (B2, Lk2, Dk), jnp.float32)
    v2 = jax.random.normal(ks[2], (B2, Lk2, Dv), jnp.float32)
    _check("tiled_keys_bf16", q2, k2, v2,
           jnp.array([0, 17, 130], jnp.int32), W_q, W_k, w_v,
           tol=2.5e-2, block_k=128)

    print("KERNEL_OK")
</pallas_src>

<mosaic_0001>
module attributes {stable_mosaic.version = 11 : i64} {
  func.func @_proj_kernel(%arg0: i32, %arg1: memref<8x20xf32, #tpu.memory_space<vmem>>, %arg2: memref<20x32xf32, #tpu.memory_space<vmem>>, %arg3: memref<8x32xf32, #tpu.memory_space<vmem>>) attributes {dimension_semantics = [#tpu.dimension_semantics<parallel>], iteration_bounds = array<i64: 1>, scalar_prefetch = 0 : i64, scratch_operands = 0 : i64, tpu.core_type = #tpu.core_type<tc>, window_params = [{transform_indices = @transform_0, window_bounds = array<i64: 8, 20>}, {pipeline_mode = #tpu.pipeline_mode<synchronous>, transform_indices = @transform_1, window_bounds = array<i64: 20, 32>}, {transform_indices = @transform_2, window_bounds = array<i64: 8, 32>}]} {
    %c0 = arith.constant 0 : index
    %c0_0 = arith.constant 0 : index
    %0 = vector.load %arg1[%c0, %c0_0] : memref<8x20xf32, #tpu.memory_space<vmem>>, vector<8x20xf32>
    %c0_1 = arith.constant 0 : index
    %c0_2 = arith.constant 0 : index
    %1 = vector.load %arg2[%c0_1, %c0_2] : memref<20x32xf32, #tpu.memory_space<vmem>>, vector<20x32xf32>
    %cst = arith.constant dense<0.000000e+00> : vector<8x32xf32>
    %2 = tpu.matmul %0, %1, %cst {dimension_numbers = #tpu.dot_dimension_numbers<[1], [0], [0], [1], [0, 0, 1, 1], [], []>} : vector<8x20xf32>, vector<20x32xf32>, vector<8x32xf32> -> vector<8x32xf32>
    %c0_3 = arith.constant 0 : index
    %c0_4 = arith.constant 0 : index
    %3 = vector.load %arg3[%c0_3, %c0_4] : memref<8x32xf32, #tpu.memory_space<vmem>>, vector<8x32xf32>
    tpu.vector_store %arg3[%c0_3, %c0_4], %2 {strides = array<i32>} : memref<8x32xf32, #tpu.memory_space<vmem>>, vector<8x32xf32>,
    return
  }
  func.func @transform_0(%arg0: i32) -> (i32, i32) {
    %c0_i32 = arith.constant 0 : i32
    %c0_i32_0 = arith.constant 0 : i32
    return %arg0, %c0_i32 : i32, i32
  }
  func.func @transform_1(%arg0: i32) -> (i32, i32) {
    %c0_i32 = arith.constant 0 : i32
    %c0_i32_0 = arith.constant 0 : i32
    %c0_i32_1 = arith.constant 0 : i32
    return %c0_i32, %c0_i32_0 : i32, i32
  }
  func.func @transform_2(%arg0: i32) -> (i32, i32) {
    %c0_i32 = arith.constant 0 : i32
    %c0_i32_0 = arith.constant 0 : i32
    return %arg0, %c0_i32 : i32, i32
  }
}

</mosaic_0001>

<bundles_post_ra>
// kernel: tpu_custom_call.1
= control target key start
LH: loop header
LB: loop body
LE: loop exit
PB: predicated region body
PF: predicated region fallthrough
CT: control target
= control target key end

     0   :  { %7 = vsyncpa [#allocation3], 0  ;;  %s257_s0 = inlined_call_operand.hbm [shape: f32[8,20], index: 0, kind: input, shape index: {}]   ;;  %s258_s1 = inlined_call_operand.hbm [shape: f32[20,32], index: 1, kind: input, shape index: {}]   ;;  %s259_s2 = inlined_call_operand.hbm [shape: f32[8,32], index: 2, kind: output, shape index: {}]  }
   0x1   :  { %8 = vsyncpa [#allocation6], 0 }
   0x2   :  { %9 = vsyncpa [#allocation4], 0  ;;  %s226_s9 = smov [#allocation2]   ;;  %s227_s11 = smov [#allocation5]  }
   0x3   :  { %s16_s10 = sshll.u32 %s226_s9, 4  ;;  %s25_s12 = sshll.u32 %s227_s11, 4  ;;  %s17_s10 = int_to_ptr.vmem [resolvable:$true] %s16_s10  ;;  %s26_s12 = int_to_ptr.vmem [resolvable:$true] %s25_s12 }
   0x4   :  { %s168_s13 = scalar_lea.vmem %s17_s10, 128  ;;  %p173_p1 = scmp.lt.s32.totalorder %s17_s10, %s17_s10 }
   0x5   :  { %p169_p0 = scmp.ne.s32.totalorder %s17_s10, %s168_s13  ;;  %p174_p2 = scmp.lt.s32.totalorder %s168_s13, %s168_s13 }
   0x7   :  { %p175_p3 = por %p174_p2, %p173_p1 }
   0x9   :  { %p176_p4 = pnand %p175_p3, %p169_p0 }
   0xb   :  { %179 = shalt.err (!%p176_p4)
}
   0xc   :  { %19 = dma.hbm_to_vmem [thread:$0]  %s257_s0, 128, %s17_s10, [#allocation3]  }
   0xd   :  { %s188_s16 = scalar_lea.vmem %s26_s12, 384  ;;  %p193_p6 = scmp.lt.s32.totalorder %s26_s12, %s26_s12 }
   0xe   :  { %p189_p5 = scmp.ne.s32.totalorder %s26_s12, %s188_s16  ;;  %p194_p7 = scmp.lt.s32.totalorder %s188_s16, %s188_s16 }
  0x10   :  { %p195_p8 = por %p194_p7, %p193_p6 }
  0x12   :  { %p196_p9 = pnand %p195_p8, %p189_p5 }
  0x14   :  { %199 = shalt.err (!%p196_p9)
}
  0x15   :  { %s228_s17 = smov 128   ;;  %s229_s18 = smov 8  }
  0x16   :  { %31 = dma.hbm_to_vmem [thread:$0]  %s258_s1, 384, %s26_s12, [#allocation6], %s228_s17, %s228_s17, %s229_s18  }
  0x17   :  { %220 = dma.done.wait [#allocation3], 128  }
  0x18   :  { %221 = vsyncadd [#allocation3], 4294967168 }
  0x19   :  { %222 = dma.done.wait [#allocation6], 384  }
  0x1a   :  { %223 = vsyncadd [#allocation6], 4294966912  ;;  %v230_v0 = vmov 0.0   ;;  %vm231_vm0 = vmmov 0   ;;  %vm46_vm1 = vcmask 1043456   ;;  %v40_v2 = vld [vmem:[#allocation5 + $0x8] sm:$0xff] }
  0x1b   :  { %144 = vmatprep.subr.mxu0 %v230_v0  ;;  %150 = vmatprep.mubr.msk.f32.mxu0 %vm231_vm0, %v230_v0  ;;  %v41_v1 = vld [vmem:[#allocation5 + $0x10] sm:$0xf]  ;;  %v39_v3 = vld [vmem:[#allocation5] sm:$0xff]  ;;  %v38_v4 = vld [vmem:[#allocation2] sm:$0xff]  ;;  %vm42_vm2 = vcmask 162816   ;;  %s232_s0 = smov [#allocation7]  }
  0x1c   :  { %145 = vmatpush3.msk.msra.mxu0 %vm46_vm1, %v41_v1  ;;  %s128_s1 = sshll.u32 %s232_s0, 4  ;;  %vm120_vm3 = vcmask 261120   ;;  %s129_s1 = int_to_ptr.vmem [resolvable:$true] %s128_s1 }
  0x1d   :  { %146 = vmatprep.subr.mxu0 %v230_v0  ;;  %s200_s21 = scalar_lea.vmem %s129_s1, 128  ;;  %p205_p11 = scmp.lt.s32.totalorder %s129_s1, %s129_s1 }
  0x1e   :  { %147 = vmatpush3.msra.mxu0 %v40_v2  ;;  %p201_p10 = scmp.ne.s32.totalorder %s129_s1, %s200_s21  ;;  %p206_p12 = scmp.lt.s32.totalorder %s200_s21, %s200_s21 }
  0x1f   :  { %148 = vmatprep.subr.mxu0 %v230_v0 }
  0x20   :  { %149 = vmatpush3.msra.mxu0 %v39_v3  ;;  %p207_p13 = por %p206_p12, %p205_p11 }
  0x21   :  { %151 = vmatmul.mubr.msk.f32.vlgmr.msra.gmra.mxu0 %vm42_vm2, %v38_v4 }
  0x22   :  { %p208_p0 = pnand %p207_p13, %p201_p10 }
  0xe1   :  { %v116_v5 = vpop.f32.mrf.mxu0 }
  0xe2   :  { %121 = vst.msk [vmem:[#allocation7] sm:$0xff] %vm120_vm3, %v116_v5 }
  0xe3   :  { %v152_v6 = vpop.f32.mrf.mxu0 }
  0xe4   :  { %211 = shalt.err (!%p208_p0)
}
  0xe5   :  { %131 = dma.vmem_to_hbm [thread:$0]  %s129_s1, 128, %s259_s2, [#allocation4]  }
  0xe6   :  { %224 = dma.done.wait [#allocation4], 128  }
  0xe7   :  { %225 = vsyncadd [#allocation4], 4294967168 }
  0xe8   :  { %135 = vsyncpa [#allocation3], 1 }
  0xe9   :  { %136 = vsyncpa [#allocation6], 1 }
  0xea   :  { %137 = vsyncpa [#allocation4], 1 }

</bundles_post_ra>
